<compile_context>
chip_gen: v6e
topology: v6e:2x2x1
jax: 0.10.0
libtpu: 0.0.40
codegen_flags: <defaults>
</compile_context>

<pallas_src>
import functools

import jax
import jax.numpy as jnp
from jax.experimental import pallas as pl
from jax.experimental.pallas import tpu as pltpu

_LANE = 128


def _round_up(x, m):
    return (x + m - 1) // m * m


# --------------------------------------------------------------------------
# Kernel: fused [x @ W1 + b1 -> ReLU -> @ W2 + b2 -> ReLU -> ...] for one
# batch tile. Variable number of layers: refs = (w1, b1, w2, b2, ..., o_ref).
# --------------------------------------------------------------------------
def _fcnet_kernel(x_ref, *refs):
    o_ref = refs[-1]
    layer_refs = refs[:-1]
    h = x_ref[...]
    for li in range(0, len(layer_refs), 2):
        w_ref = layer_refs[li]
        b_ref = layer_refs[li + 1]
        # MXU matmul with f32 accumulate; bias + ReLU are free VPU filler.
        h = jnp.dot(h.astype(w_ref.dtype), w_ref[...],
                    preferred_element_type=jnp.float32)
        h = jnp.maximum(h + b_ref[...], 0.0)
    o_ref[...] = h.astype(o_ref.dtype)


# --------------------------------------------------------------------------
# Parameter setup (one-time glue, NOT on the per-forward path)
# --------------------------------------------------------------------------
def init_fcnet_params(key, dims):
    """Deterministic init mimicking nn.Linear defaults + weight_norm(dim=None)."""
    params = []
    for i in range(len(dims) - 1):
        in_dim, out_dim = dims[i], dims[i + 1]
        key, kv, kb, _ = jax.random.split(key, 4)
        bound = 1.0 / jnp.sqrt(in_dim)
        # weight_norm direction tensor v, PyTorch layout [out, in]
        v = jax.random.uniform(kv, (out_dim, in_dim), jnp.float32, -bound, bound)
        # weight_norm with dim=None: scalar g, initialized to ||v||_F
        g = jnp.sqrt(jnp.sum(v * v))
        b = jax.random.uniform(kb, (out_dim,), jnp.float32, -bound, bound)
        params.append((v, g, b))
    return params


def fold_fcnet_params(params, lane=_LANE):
    """Fold weight_norm, transpose to [in, out], zero-pad out-dims to a lane
    multiple (and the matching next layer's in-dims). Returns (folded, out_dim).

    Done ONCE; the forward then issues exactly one pallas_call.
    """
    folded = []
    prev_out_pad = None
    true_out_dim = None
    for v, g, b in params:
        out_dim, in_dim = v.shape
        # weight_norm(dim=None): w = g * v / ||v||_F   (norm over ORIGINAL v)
        w_eff = (g / jnp.sqrt(jnp.sum(v * v))) * v          # [out, in]
        w_t = jnp.transpose(w_eff)                          # [in, out]
        out_pad = _round_up(out_dim, lane)
        in_rows = in_dim if prev_out_pad is None else prev_out_pad
        w_pad = jnp.zeros((in_rows, out_pad), w_t.dtype).at[:in_dim, :out_dim].set(w_t)
        b_pad = jnp.zeros((1, out_pad), b.dtype).at[0, :out_dim].set(b)
        folded.append((w_pad, b_pad))
        prev_out_pad = out_pad
        true_out_dim = out_dim
    return folded, true_out_dim


# --------------------------------------------------------------------------
# Forward: one fused pallas_call over a batch grid
# --------------------------------------------------------------------------
@functools.partial(jax.jit, static_argnames=("true_out_dim", "tile_n"))
def fcnet_forward(x, folded, true_out_dim, *, tile_n=512):
    """FCNet eval-mode forward: single fused Pallas kernel for all layers."""
    # TODO(synk): training-mode Dropout (stochastic masking) not implemented;
    # eval semantics (identity) are used. Would need pltpu.prng_random_bits.
    n, d_in = x.shape
    out_pad = folded[-1][0].shape[1]

    # Batch tiling: large row tiles amortize the ~0.35 us/step overhead;
    # shrink for tiny batches. Pad batch to a tile multiple (no-op when exact).
    tile = min(tile_n, _round_up(n, 8))
    n_pad = _round_up(n, tile)
    x_p = x if n_pad == n else jnp.pad(x, ((0, n_pad - n), (0, 0)))

    in_specs = [pl.BlockSpec((tile, d_in), lambda i: (i, 0))]
    args = [x_p]
    for w, b in folded:
        # Constant-index blocks: weights/biases stay VMEM-resident across steps.
        in_specs.append(pl.BlockSpec(w.shape, lambda i: (0, 0)))
        in_specs.append(pl.BlockSpec(b.shape, lambda i: (0, 0)))
        args.append(w)
        args.append(b)

    y = pl.pallas_call(
        _fcnet_kernel,
        out_shape=jax.ShapeDtypeStruct((n_pad, out_pad), x.dtype),
        grid_spec=pltpu.PrefetchScalarGridSpec(
            num_scalar_prefetch=0,
            grid=(n_pad // tile,),
            in_specs=in_specs,
            out_specs=pl.BlockSpec((tile, out_pad), lambda i: (i, 0)),
        ),
        compiler_params=pltpu.CompilerParams(
            dimension_semantics=("parallel",),  # v7x: shard batch tiles over 2 TCs
        ),
    )(*args)

    if n_pad != n or out_pad != true_out_dim:
        y = y[:n, :true_out_dim]   # strip batch + lane padding
    return y


# --------------------------------------------------------------------------
# Demo / self-check
# --------------------------------------------------------------------------
if __name__ == "__main__":
    key = jax.random.PRNGKey(0)
    dims = [32, 64, 32]          # FCNet(dims=[32,64,32], dropout=0.0, 'weight', 'ReLU')
    batch = 8

    key, kx = jax.random.split(key)
    x = jax.random.normal(kx, (batch, dims[0]), jnp.float32)

    params = init_fcnet_params(key, dims)
    folded, true_out_dim = fold_fcnet_params(params)   # one-time parameter glue

    out = fcnet_forward(x, folded, true_out_dim)
    out = jax.block_until_ready(out)

    # Pure-JAX reference (same eval-mode semantics).
    ref = x
    for v, g, b in params:
        w = (g / jnp.sqrt(jnp.sum(v * v))) * v          # weight_norm(dim=None)
        ref = jnp.maximum(ref @ w.T + b, 0.0)

    assert out.shape == (batch, dims[-1])
    assert bool(jnp.all(out >= 0.0))
    assert bool(jnp.allclose(out, ref, atol=1e-2, rtol=1e-2))

    print("KERNEL_OK")
</pallas_src>

<mosaic_0001>
module attributes {stable_mosaic.version = 11 : i64} {
  func.func @_fcnet_kernel(%arg0: i32, %arg1: memref<8x32xf32, #tpu.memory_space<vmem>>, %arg2: memref<32x128xf32, #tpu.memory_space<vmem>>, %arg3: memref<1x128xf32, #tpu.memory_space<vmem>>, %arg4: memref<128x128xf32, #tpu.memory_space<vmem>>, %arg5: memref<1x128xf32, #tpu.memory_space<vmem>>, %arg6: memref<8x128xf32, #tpu.memory_space<vmem>>) attributes {dimension_semantics = [#tpu.dimension_semantics<parallel>], iteration_bounds = array<i64: 1>, scalar_prefetch = 0 : i64, scratch_operands = 0 : i64, tpu.core_type = #tpu.core_type<tc>, window_params = [{transform_indices = @transform_0, window_bounds = array<i64: 8, 32>}, {pipeline_mode = #tpu.pipeline_mode<synchronous>, transform_indices = @transform_1, window_bounds = array<i64: 32, 128>}, {pipeline_mode = #tpu.pipeline_mode<synchronous>, transform_indices = @transform_2, window_bounds = array<i64: 1, 128>}, {pipeline_mode = #tpu.pipeline_mode<synchronous>, transform_indices = @transform_3, window_bounds = array<i64: 128, 128>}, {pipeline_mode = #tpu.pipeline_mode<synchronous>, transform_indices = @transform_4, window_bounds = array<i64: 1, 128>}, {transform_indices = @transform_5, window_bounds = array<i64: 8, 128>}]} {
    %c0 = arith.constant 0 : index
    %c0_0 = arith.constant 0 : index
    %0 = vector.load %arg1[%c0, %c0_0] : memref<8x32xf32, #tpu.memory_space<vmem>>, vector<8x32xf32>
    %c0_1 = arith.constant 0 : index
    %c0_2 = arith.constant 0 : index
    %1 = vector.load %arg2[%c0_1, %c0_2] : memref<32x128xf32, #tpu.memory_space<vmem>>, vector<32x128xf32>
    %cst = arith.constant dense<0.000000e+00> : vector<8x128xf32>
    %2 = tpu.matmul %0, %1, %cst {dimension_numbers = #tpu.dot_dimension_numbers<[1], [0], [0], [1], [0, 0, 1, 1], [], []>} : vector<8x32xf32>, vector<32x128xf32>, vector<8x128xf32> -> vector<8x128xf32>
    %c0_3 = arith.constant 0 : index
    %c0_4 = arith.constant 0 : index
    %3 = vector.load %arg3[%c0_3, %c0_4] : memref<1x128xf32, #tpu.memory_space<vmem>>, vector<1x128xf32>
    %4 = vector.broadcast %3 : vector<1x128xf32> to vector<8x128xf32>
    %5 = arith.addf %2, %4 : vector<8x128xf32>
    %cst_5 = arith.constant 0.000000e+00 : f32
    %6 = vector.broadcast %cst_5 : f32 to vector<8x128xf32>
    %7 = arith.maximumf %5, %6 : vector<8x128xf32>
    %c0_6 = arith.constant 0 : index
    %c0_7 = arith.constant 0 : index
    %8 = vector.load %arg4[%c0_6, %c0_7] : memref<128x128xf32, #tpu.memory_space<vmem>>, vector<128x128xf32>
    %cst_8 = arith.constant dense<0.000000e+00> : vector<8x128xf32>
    %9 = tpu.matmul %7, %8, %cst_8 {dimension_numbers = #tpu.dot_dimension_numbers<[1], [0], [0], [1], [0, 0, 1, 1], [], []>} : vector<8x128xf32>, vector<128x128xf32>, vector<8x128xf32> -> vector<8x128xf32>
    %c0_9 = arith.constant 0 : index
    %c0_10 = arith.constant 0 : index
    %10 = vector.load %arg5[%c0_9, %c0_10] : memref<1x128xf32, #tpu.memory_space<vmem>>, vector<1x128xf32>
    %11 = vector.broadcast %10 : vector<1x128xf32> to vector<8x128xf32>
    %12 = arith.addf %9, %11 : vector<8x128xf32>
    %cst_11 = arith.constant 0.000000e+00 : f32
    %13 = vector.broadcast %cst_11 : f32 to vector<8x128xf32>
    %14 = arith.maximumf %12, %13 : vector<8x128xf32>
    %c0_12 = arith.constant 0 : index
    %c0_13 = arith.constant 0 : index
    %15 = vector.load %arg6[%c0_12, %c0_13] : memref<8x128xf32, #tpu.memory_space<vmem>>, vector<8x128xf32>
    tpu.vector_store %arg6[%c0_12, %c0_13], %14 {strides = array<i32>} : memref<8x128xf32, #tpu.memory_space<vmem>>, vector<8x128xf32>,
    return
  }
  func.func @transform_0(%arg0: i32) -> (i32, i32) {
    %c0_i32 = arith.constant 0 : i32
    %c0_i32_0 = arith.constant 0 : i32
    return %arg0, %c0_i32 : i32, i32
  }
  func.func @transform_1(%arg0: i32) -> (i32, i32) {
    %c0_i32 = arith.constant 0 : i32
    %c0_i32_0 = arith.constant 0 : i32
    %c0_i32_1 = arith.constant 0 : i32
    return %c0_i32, %c0_i32_0 : i32, i32
  }
  func.func @transform_2(%arg0: i32) -> (i32, i32) {
    %c0_i32 = arith.constant 0 : i32
    %c0_i32_0 = arith.constant 0 : i32
    %c0_i32_1 = arith.constant 0 : i32
    return %c0_i32, %c0_i32_0 : i32, i32
  }
  func.func @transform_3(%arg0: i32) -> (i32, i32) {
    %c0_i32 = arith.constant 0 : i32
    %c0_i32_0 = arith.constant 0 : i32
    %c0_i32_1 = arith.constant 0 : i32
    return %c0_i32, %c0_i32_0 : i32, i32
  }
  func.func @transform_4(%arg0: i32) -> (i32, i32) {
    %c0_i32 = arith.constant 0 : i32
    %c0_i32_0 = arith.constant 0 : i32
    %c0_i32_1 = arith.constant 0 : i32
    return %c0_i32, %c0_i32_0 : i32, i32
  }
  func.func @transform_5(%arg0: i32) -> (i32, i32) {
    %c0_i32 = arith.constant 0 : i32
    %c0_i32_0 = arith.constant 0 : i32
    return %arg0, %c0_i32 : i32, i32
  }
}

</mosaic_0001>

<bundles_post_ra>
// kernel: fcnet_forward.1
= control target key start
LH: loop header
LB: loop body
LE: loop exit
PB: predicated region body
PF: predicated region fallthrough
CT: control target
= control target key end

     0   :  { %10 = vsyncpa [#allocation3], 0  ;;  %s501_s0 = inlined_call_operand.hbm [shape: f32[8,32], index: 0, kind: input, shape index: {}]   ;;  %s502_s1 = inlined_call_operand.hbm [shape: f32[32,128], index: 1, kind: input, shape index: {}]   ;;  %s503_s2 = inlined_call_operand.vmem [shape: f32[1,128], index: 2, kind: input, shape index: {}]   ;;  %s504_s3 = inlined_call_operand.hbm [shape: f32[128,128], index: 3, kind: input, shape index: {}]   ;;  %s505_s4 = inlined_call_operand.vmem [shape: f32[1,128], index: 4, kind: input, shape index: {}]   ;;  %s506_s5 = inlined_call_operand.hbm [shape: f32[8,128], index: 5, kind: output, shape index: {}]  }
   0x1   :  { %11 = vsyncpa [#allocation6], 0 }
   0x2   :  { %12 = vsyncpa [#allocation4], 0  ;;  %s423_s18 = smov [#allocation5]  }
   0x3   :  { %s28_s19 = sshll.u32 %s423_s18, 4  ;;  %s29_s19 = int_to_ptr.vmem [resolvable:$true] %s28_s19 }
   0x4   :  { %s345_s20 = scalar_lea.vmem %s29_s19, 512  ;;  %p350_p1 = scmp.lt.s32.totalorder %s29_s19, %s29_s19 }
   0x5   :  { %p346_p0 = scmp.ne.s32.totalorder %s29_s19, %s345_s20  ;;  %p351_p2 = scmp.lt.s32.totalorder %s345_s20, %s345_s20 }
   0x7   :  { %p352_p3 = por %p351_p2, %p350_p1 }
   0x9   :  { %p353_p4 = pnand %p352_p3, %p346_p0 }
   0xb   :  { %356 = shalt.err (!%p353_p4)
}
   0xc   :  { %s424_s21 = smov 128   ;;  %s425_s22 = smov 8  }
   0xd   :  { %34 = dma.hbm_to_vmem [thread:$0]  %s502_s1, 512, %s29_s19, [#allocation6], %s424_s21, %s424_s21, %s425_s22  }
   0xe   :  { %s426_s25 = smov [#allocation2]   ;;  %s427_s27 = smov [#allocation7]  }
   0xf   :  { %s19_s26 = sshll.u32 %s426_s25, 4  ;;  %s42_s28 = sshll.u32 %s427_s27, 4  ;;  %s20_s26 = int_to_ptr.vmem [resolvable:$true] %s19_s26  ;;  %s43_s28 = int_to_ptr.vmem [resolvable:$true] %s42_s28 }
  0x10   :  { %s365_s29 = scalar_lea.vmem %s20_s26, 128  ;;  %p370_p6 = scmp.lt.s32.totalorder %s20_s26, %s20_s26 }
  0x11   :  { %p366_p5 = scmp.ne.s32.totalorder %s20_s26, %s365_s29  ;;  %p371_p7 = scmp.lt.s32.totalorder %s365_s29, %s365_s29 }
  0x13   :  { %p372_p8 = por %p371_p7, %p370_p6 }
  0x15   :  { %p373_p9 = pnand %p372_p8, %p366_p5 }
  0x17   :  { %376 = shalt.err (!%p373_p9)
}
  0x18   :  { %22 = dma.hbm_to_vmem [thread:$0]  %s501_s0, 128, %s20_s26, [#allocation3]  }
  0x19   :  { %s385_s7 = scalar_lea.vmem %s43_s28, 2048  ;;  %p390_p11 = scmp.lt.s32.totalorder %s43_s28, %s43_s28 }
  0x1a   :  { %p386_p10 = scmp.ne.s32.totalorder %s43_s28, %s385_s7  ;;  %p391_p12 = scmp.lt.s32.totalorder %s385_s7, %s385_s7 }
  0x1c   :  { %p392_p13 = por %p391_p12, %p390_p11 }
  0x1e   :  { %p393_p0 = pnand %p392_p13, %p386_p10 }
  0x20   :  { %396 = shalt.err (!%p393_p0)
}
  0x21   :  { %48 = dma.hbm_to_vmem [thread:$0]  %s504_s3, 2048, %s43_s28, [#allocation6], %s424_s21, %s424_s21, %s425_s22  }
  0x22   :  { %417 = dma.done.wait [#allocation3], 128  }
  0x23   :  { %418 = vsyncadd [#allocation3], 4294967168 }
  0x24   :  { %419 = dma.done.wait [#allocation6], 2560  }
  0x25   :  { %420 = vsyncadd [#allocation6], 4294964736  ;;  %v428_v0 = vmov 0.0   ;;  %vm429_vm0 = vmmov 0   ;;  %v64_v1 = vld [vmem:[#allocation5 + $0x18] sm:$0xff]  ;;  %v63_v2 = vld [vmem:[#allocation5 + $0x10] sm:$0xff] }
  0x26   :  { %283 = vmatprep.subr.mxu0 %v428_v0  ;;  %291 = vmatprep.mubr.msk.f32.mxu0 %vm429_vm0, %v428_v0  ;;  %v162_v3 = vld [vmem:[#allocation7 + $0x78] sm:$0xff]  ;;  %v62_v4 = vld [vmem:[#allocation5 + $0x8] sm:$0xff]  ;;  %v161_v5 = vld [vmem:[#allocation7 + $0x70] sm:$0xff]  ;;  %vm72_vm1 = vcmask 261120   ;;  %s430_s11 = smov [#allocation8]  }
  0x27   :  { %294 = vmatprep.subr.mxu1 %v428_v0  ;;  %326 = vmatprep.mubr.msk.f32.mxu1 %vm429_vm0, %v428_v0  ;;  %v160_v6 = vld [vmem:[#allocation7 + $0x68] sm:$0xff]  ;;  %v61_v7 = vld [vmem:[#allocation5] sm:$0xff]  ;;  %v60_v8 = vld [vmem:[#allocation2] sm:$0xff]  ;;  %s248_s12 = sshll.u32 %s430_s11, 4  ;;  %s249_s12 = int_to_ptr.vmem [resolvable:$true] %s248_s12 }
  0x28   :  { %284 = vmatpush3.msra.mxu0 %v64_v1  ;;  %295 = vmatpush3.msra.mxu1 %v162_v3  ;;  %v159_v9 = vld [vmem:[#allocation7 + $0x60] sm:$0xff]  ;;  %v158_v10 = vld [vmem:[#allocation7 + $0x58] sm:$0xff]  ;;  %v157_v11 = vld [vmem:[#allocation7 + $0x50] sm:$0xff]  ;;  %s397_s13 = scalar_lea.vmem %s249_s12, 128  ;;  %p402_p2 = scmp.lt.s32.totalorder %s249_s12, %s249_s12 }
  0x29   :  { %285 = vmatprep.subr.mxu0 %v428_v0  ;;  %296 = vmatprep.subr.mxu1 %v428_v0  ;;  %v156_v12 = vld [vmem:[#allocation7 + $0x48] sm:$0xff]  ;;  %v155_v13 = vld [vmem:[#allocation7 + $0x40] sm:$0xff]  ;;  %v154_v14 = vld [vmem:[#allocation7 + $0x38] sm:$0xff]  ;;  %p398_p1 = scmp.ne.s32.totalorder %s249_s12, %s397_s13  ;;  %p403_p3 = scmp.lt.s32.totalorder %s397_s13, %s397_s13 }
  0x2a   :  { %286 = vmatpush3.msra.mxu0 %v63_v2  ;;  %297 = vmatpush3.msra.mxu1 %v161_v5  ;;  %v153_v15 = vld [vmem:[#allocation7 + $0x30] sm:$0xff]  ;;  %v152_v16 = vld [vmem:[#allocation7 + $0x28] sm:$0xff]  ;;  %v151_v17 = vld [vmem:[#allocation7 + $0x20] sm:$0xff] }
  0x2b   :  { %287 = vmatprep.subr.mxu0 %v428_v0  ;;  %298 = vmatprep.subr.mxu1 %v428_v0  ;;  %v150_v18 = vld [vmem:[#allocation7 + $0x18] sm:$0xff]  ;;  %v149_v19 = vld [vmem:[#allocation7 + $0x10] sm:$0xff]  ;;  %v148_v20 = vld [vmem:[#allocation7 + $0x8] sm:$0xff]  ;;  %p404_p4 = por %p403_p3, %p402_p2 }
  0x2c   :  { %288 = vmatpush3.msra.mxu0 %v62_v4  ;;  %299 = vmatpush3.msra.mxu1 %v160_v6  ;;  %v147_v21 = vld [vmem:[#allocation7] sm:$0xff]  ;;  %v258_v22 = vld [vmem:[%s503_s2] ss:$0 sm:$0xff] }
  0x2d   :  { %289 = vmatprep.subr.mxu0 %v428_v0  ;;  %300 = vmatprep.subr.mxu1 %v428_v0  ;;  %v260_v27 = vld [vmem:[%s505_s4] ss:$0 sm:$0xff]  ;;  %p405_p5 = pnand %p404_p4, %p398_p1 }
  0x2e   :  { %290 = vmatpush3.msra.mxu0 %v61_v7  ;;  %301 = vmatpush3.msra.mxu1 %v159_v9 }
  0x2f   :  { %292 = vmatmul.mubr.msk.f32.vlgmr.msra.gmra.mxu0 %vm72_vm1, %v60_v8  ;;  %302 = vmatprep.subr.mxu1 %v428_v0 }
  0x30   :  { %303 = vmatpush3.msra.mxu1 %v158_v10 }
  0x31   :  { %304 = vmatprep.subr.mxu1 %v428_v0 }
  0x32   :  { %305 = vmatpush3.msra.mxu1 %v157_v11 }
  0x33   :  { %306 = vmatprep.subr.mxu1 %v428_v0 }
  0x34   :  { %307 = vmatpush3.msra.mxu1 %v156_v12 }
  0x35   :  { %308 = vmatprep.subr.mxu1 %v428_v0 }
  0x36   :  { %309 = vmatpush3.msra.mxu1 %v155_v13 }
  0x37   :  { %310 = vmatprep.subr.mxu1 %v428_v0 }
  0x38   :  { %311 = vmatpush3.msra.mxu1 %v154_v14 }
  0x39   :  { %312 = vmatprep.subr.mxu1 %v428_v0 }
  0x3a   :  { %313 = vmatpush3.msra.mxu1 %v153_v15 }
  0x3b   :  { %314 = vmatprep.subr.mxu1 %v428_v0 }
  0x3c   :  { %315 = vmatpush3.msra.mxu1 %v152_v16 }
  0x3d   :  { %316 = vmatprep.subr.mxu1 %v428_v0 }
  0x3e   :  { %317 = vmatpush3.msra.mxu1 %v151_v17 }
  0x3f   :  { %318 = vmatprep.subr.mxu1 %v428_v0 }
  0x40   :  { %319 = vmatpush3.msra.mxu1 %v150_v18 }
  0x41   :  { %320 = vmatprep.subr.mxu1 %v428_v0 }
  0x42   :  { %321 = vmatpush3.msra.mxu1 %v149_v19 }
  0x43   :  { %322 = vmatprep.subr.mxu1 %v428_v0 }
  0x44   :  { %323 = vmatpush3.msra.mxu1 %v148_v20 }
  0x45   :  { %324 = vmatprep.subr.mxu1 %v428_v0 }
  0x46   :  { %325 = vmatpush3.msra.mxu1 %v147_v21 }
  0xef   :  { %v142_v23 = vpop.f32.mrf.mxu0 }
  0xf0   :  { %v143_v24 = vadd.f32 %v258_v22, %v142_v23 }
  0xf1   :  { %v293_v25 = vpop.f32.mrf.mxu0 }
  0xf2   :  { %v146_v26 = vmax.f32 %v143_v24, 0.0 }
  0xf4   :  { %327 = vmatmul.mubr.f32.vlgmr.msra.gmra.mxu1 %v146_v26 }
 0x1b4   :  { %v236_v28 = vpop.f32.mrf.mxu1 }
 0x1b5   :  { %v237_v29 = vadd.f32 %v260_v27, %v236_v28 }
 0x1b6   :  { %v328_v30 = vpop.f32.mrf.mxu1 }
 0x1b7   :  { %v240_v31 = vmax.f32 %v237_v29, 0.0 }
 0x1b9   :  { %241 = vst [vmem:[#allocation8] sm:$0xff] %v240_v31 }
 0x1ba   :  { %408 = shalt.err (!%p405_p5)
}
 0x1bb   :  { %251 = dma.vmem_to_hbm [thread:$0]  %s249_s12, 128, %s506_s5, [#allocation4]  }
 0x1bc   :  { %421 = dma.done.wait [#allocation4], 128  }
 0x1bd   :  { %422 = vsyncadd [#allocation4], 4294967168 }
 0x1be   :  { %255 = vsyncpa [#allocation3], 1 }
 0x1bf   :  { %256 = vsyncpa [#allocation6], 1 }
 0x1c0   :  { %257 = vsyncpa [#allocation4], 1 }

</bundles_post_ra>
